<compile_context>
chip_gen: v7x
topology: tpu7x:2x2x1
jax: 0.10.0
libtpu: 0.0.40
codegen_flags: <defaults>
</compile_context>

<pallas_src>
import functools

import jax
import jax.numpy as jnp
from jax import lax
from jax.experimental import pallas as pl
from jax.experimental.pallas import tpu as pltpu

SUBLANES = 8                  # second-minor dim of every block
LANES = 128                   # minor-dim granularity
MIB = 1024 * 1024
DEFAULT_TILE_LANES = 131072   # 8 x 131072 x 4 B = 4 MiB per f32 input tile
NSPLIT = 2                    # phase-1 reduction split (both TCs on v7x)


def _vmem_budget_bytes():
    """Scoped-VMEM budget to request; leaves headroom below physical capacity."""
    try:
        phys = pltpu.get_tpu_info().vmem_capacity_bytes
    except Exception:
        phys = 64 * MIB                      # conservative (v7x-sized) fallback
    if phys <= 64 * MIB:                     # v7x: 64 MiB physical per TC
        return 48 * MIB
    return 64 * MIB                          # v5e / v6e: 128 MiB physical


# --------------------------------------------------------------------------- #
# Fast path: whole problem resident in VMEM, single pass.
# --------------------------------------------------------------------------- #
def _micro_fused_kernel(t_ref, a_ref, b_ref, o_ref):
    a = a_ref[...].astype(jnp.float32)                       # (8, cols)
    b = b_ref[...].astype(jnp.float32)
    row = jnp.sum(a * b, axis=1, keepdims=True)              # lane reduce -> (8, 1)
    dot_ab = jnp.sum(row, axis=0, keepdims=True)             # sublane reduce -> (1, 1)
    t = t_ref[...].astype(jnp.float32)                       # (1, 1)
    omt = 1.0 - t
    inv = lax.rsqrt(t * t + omt * omt + 2.0 * t * omt * dot_ab)   # (1, 1), EUP
    o_ref[...] = (a * (omt * inv) + b * (t * inv)).astype(o_ref.dtype)


# --------------------------------------------------------------------------- #
# Tiled two-pass path (for N too large to keep resident).
# --------------------------------------------------------------------------- #
def _partial_dot_kernel(a_ref, b_ref, dot_ref, *, tiles_per_core, num_valid_tiles):
    """Accumulate per-core dot partials across the trailing ('arbitrary') axis."""
    k = pl.program_id(1)

    @pl.when(k == 0)
    def _init():
        dot_ref[...] = jnp.zeros_like(dot_ref)

    gt = pl.program_id(0) * tiles_per_core + k               # global tile index

    @pl.when(gt < num_valid_tiles)
    def _acc():
        prod = a_ref[...].astype(jnp.float32) * b_ref[...].astype(jnp.float32)
        psum = jnp.sum(jnp.sum(prod, axis=1, keepdims=True), axis=0, keepdims=True)
        dot_ref[0] = dot_ref[0] + psum                       # (1, 1) accumulator


def _blend_kernel(t_ref, dot_ref, a_ref, b_ref, o_ref):
    """out = (1-t)/denom * a + t/denom * b — coefficients computed in-kernel."""
    t = t_ref[...].astype(jnp.float32)                       # (1, 1)
    dparts = dot_ref[...]                                    # (NSPLIT, 1, 1) f32
    dot_ab = dparts[0]
    for i in range(1, NSPLIT):
        dot_ab = dot_ab + dparts[i]                          # (1, 1)
    omt = 1.0 - t
    inv = lax.rsqrt(t * t + omt * omt + 2.0 * t * omt * dot_ab)
    a = a_ref[...].astype(jnp.float32)
    b = b_ref[...].astype(jnp.float32)
    o_ref[...] = (a * (omt * inv) + b * (t * inv)).astype(o_ref.dtype)


# --------------------------------------------------------------------------- #
# Wrapper
# --------------------------------------------------------------------------- #
@functools.partial(jax.jit, static_argnames=("tile_lanes", "force_tiled"))
def micro_forward(feat_clear, feat_cor, t, *, tile_lanes=DEFAULT_TILE_LANES,
                  force_tiled=False):
    """feat_clear, feat_cor: 1-D vectors of equal length N; t: scalar weight."""
    N = feat_clear.shape[0]
    assert feat_clear.ndim == 1 and feat_cor.shape == (N,), \
        "feat_clear / feat_cor must be 1-D of equal length"
    out_dtype = feat_clear.dtype
    in_bytes = feat_clear.dtype.itemsize
    out_bytes = jnp.dtype(out_dtype).itemsize

    budget = _vmem_budget_bytes()
    t11 = jnp.asarray(t, jnp.float32).reshape(1, 1)

    # ---- fast path: everything resident in VMEM, one pass --------------------
    # inputs + output + ~3 full-size f32 temporaries must fit with headroom.
    fused_est = N * (2 * in_bytes + out_bytes + 3 * 4)
    if not force_tiled and fused_est <= int(0.7 * budget):
        pad = (-N) % SUBLANES
        Np = N + pad
        cols = Np // SUBLANES
        a = feat_clear if pad == 0 else jnp.pad(feat_clear, (0, pad))
        b = feat_cor if pad == 0 else jnp.pad(feat_cor, (0, pad))
        a2 = a.reshape(SUBLANES, cols)
        b2 = b.reshape(SUBLANES, cols)
        out2 = pl.pallas_call(
            _micro_fused_kernel,
            out_shape=jax.ShapeDtypeStruct((SUBLANES, cols), out_dtype),
            compiler_params=pltpu.CompilerParams(vmem_limit_bytes=budget),
        )(t11, a2, b2)
        out = out2.reshape(Np)
        return out if pad == 0 else out[:N]

    # ---- tiled two-pass path --------------------------------------------------
    # Clamp tile size to (a) a multiple of 128, (b) the minimum needed for N,
    # (c) the VMEM budget (phase-2 worst case: 2 bufs x 2 inputs + 2 bufs x out
    # + ~2 f32 temps, all 8 sublanes tall).
    tile_lanes = max(LANES, (int(tile_lanes) // LANES) * LANES)
    cols_min = pl.cdiv(N, SUBLANES * LANES) * LANES
    per_col = SUBLANES * (4 * in_bytes + 2 * out_bytes + 2 * 4)
    max_lanes = max(LANES, ((int(0.8 * budget) // per_col) // LANES) * LANES)
    tile_lanes = min(tile_lanes, cols_min, max_lanes)

    chunk = SUBLANES * tile_lanes
    pad = (-N) % chunk
    P = N + pad
    cols = P // SUBLANES
    num_tiles = cols // tile_lanes

    a = feat_clear if pad == 0 else jnp.pad(feat_clear, (0, pad))
    b = feat_cor if pad == 0 else jnp.pad(feat_cor, (0, pad))
    a2 = a.reshape(SUBLANES, cols)
    b2 = b.reshape(SUBLANES, cols)

    # Phase 1: dot product, reduction split 2-way across the 'parallel' axis so
    # v7x's two TensorCores each own half the tiles and one (1,1,1) accumulator.
    tpc = pl.cdiv(num_tiles, NSPLIT)
    p1_vec_spec = pl.BlockSpec(
        (SUBLANES, tile_lanes),
        lambda c, k: (0, jnp.minimum(c * tpc + k, num_tiles - 1)))

    dot_parts = pl.pallas_call(
        functools.partial(_partial_dot_kernel, tiles_per_core=tpc,
                          num_valid_tiles=num_tiles),
        out_shape=jax.ShapeDtypeStruct((NSPLIT, 1, 1), jnp.float32),
        grid=(NSPLIT, tpc),
        in_specs=[p1_vec_spec, p1_vec_spec],
        out_specs=pl.BlockSpec((1, 1, 1), lambda c, k: (c, 0, 0)),
        compiler_params=pltpu.CompilerParams(
            dimension_semantics=("parallel", "arbitrary"),
            vmem_limit_bytes=budget),
    )(a2, b2)

    # Phase 2: blend + scale; coefficients (incl. rsqrt) computed in-kernel from
    # the phase-1 partials — no XLA glue between the two pallas_calls.
    vec_spec = pl.BlockSpec((SUBLANES, tile_lanes), lambda i: (0, i))
    out2 = pl.pallas_call(
        _blend_kernel,
        out_shape=jax.ShapeDtypeStruct((SUBLANES, cols), out_dtype),
        grid=(num_tiles,),
        in_specs=[
            pl.BlockSpec((1, 1), lambda i: (0, 0)),            # t
            pl.BlockSpec((NSPLIT, 1, 1), lambda i: (0, 0, 0)),  # dot partials
            vec_spec,
            vec_spec,
        ],
        out_specs=vec_spec,
        compiler_params=pltpu.CompilerParams(
            dimension_semantics=("parallel",),
            vmem_limit_bytes=budget),
    )(t11, dot_parts, a2, b2)

    out = out2.reshape(P)
    return out if pad == 0 else out[:N]


def micro_reference(feat_clear, feat_cor, t):
    t = jnp.asarray(t, jnp.float32)
    numerator = t * feat_cor + (1.0 - t) * feat_clear
    denominator = jnp.sqrt(t ** 2 + (1.0 - t) ** 2
                           + 2.0 * t * (1.0 - t) * jnp.dot(feat_clear, feat_cor))
    return numerator / denominator


if __name__ == "__main__":
    key = jax.random.PRNGKey(0)
    k1, k2, k3, k4, k5, k6 = jax.random.split(key, 6)

    # Case 1: fast (single-pass VMEM-resident) path; N % 8 == 0, cols not a
    # multiple of 128 (exercises whole-array non-aligned blocks).
    N1 = 1000
    a1 = jax.random.normal(k1, (N1,), dtype=jnp.float32)
    b1 = jax.random.normal(k2, (N1,), dtype=jnp.float32)
    a1 = a1 / jnp.linalg.norm(a1)
    b1 = b1 / jnp.linalg.norm(b1)
    t1 = jnp.float32(0.3)
    out1 = micro_forward(a1, b1, t1)
    jax.block_until_ready(out1)
    ref1 = micro_reference(a1, b1, t1)
    assert out1.shape == (N1,)
    assert jnp.allclose(out1, ref1, atol=1e-5, rtol=1e-5), "case 1 mismatch"

    # Case 2: ragged N (exercises the fast path's pad/slice handling).
    N2 = 777
    a2 = jax.random.normal(k3, (N2,), dtype=jnp.float32)
    b2 = jax.random.normal(k4, (N2,), dtype=jnp.float32)
    a2 = a2 / jnp.linalg.norm(a2)
    b2 = b2 / jnp.linalg.norm(b2)
    t2 = jnp.float32(0.55)
    out2 = micro_forward(a2, b2, t2)
    jax.block_until_ready(out2)
    ref2 = micro_reference(a2, b2, t2)
    assert out2.shape == (N2,)
    assert jnp.allclose(out2, ref2, atol=1e-5, rtol=1e-5), "case 2 mismatch"

    # Case 3: tiled two-pass path (forced), multi-tile reduction with the 2-way
    # core split and a masked/clamped tail tile (3 tiles across 2 slots).
    N3 = 8 * 512 * 3
    a3 = jax.random.normal(k5, (N3,), dtype=jnp.float32)
    b3 = jax.random.normal(k6, (N3,), dtype=jnp.float32)
    a3 = a3 / jnp.linalg.norm(a3)
    b3 = b3 / jnp.linalg.norm(b3)
    t3 = 0.7
    out3 = micro_forward(a3, b3, t3, tile_lanes=512, force_tiled=True)
    jax.block_until_ready(out3)
    ref3 = micro_reference(a3, b3, t3)
    assert out3.shape == (N3,)
    assert jnp.allclose(out3, ref3, atol=1e-5, rtol=1e-5), "case 3 mismatch"

    print("KERNEL_OK")
</pallas_src>

<mosaic_0001>
module attributes {stable_mosaic.version = 11 : i64} {
  func.func @_micro_fused_kernel(%arg0: memref<1x1xf32, #tpu.memory_space<vmem>>, %arg1: memref<8x125xf32, #tpu.memory_space<vmem>>, %arg2: memref<8x125xf32, #tpu.memory_space<vmem>>, %arg3: memref<8x125xf32, #tpu.memory_space<vmem>>) attributes {dimension_semantics = [], scalar_prefetch = 0 : i64, scratch_operands = 0 : i64, tpu.core_type = #tpu.core_type<tc>} {
    %c0 = arith.constant 0 : index
    %c0_0 = arith.constant 0 : index
    %0 = vector.load %arg1[%c0, %c0_0] : memref<8x125xf32, #tpu.memory_space<vmem>>, vector<8x125xf32>
    %c0_1 = arith.constant 0 : index
    %c0_2 = arith.constant 0 : index
    %1 = vector.load %arg2[%c0_1, %c0_2] : memref<8x125xf32, #tpu.memory_space<vmem>>, vector<8x125xf32>
    %2 = arith.mulf %0, %1 : vector<8x125xf32>
    %cst = arith.constant dense<0.000000e+00> : vector<8xf32>
    %3 = vector.multi_reduction <add>, %2, %cst [1] : vector<8x125xf32> to vector<8xf32>
    %4 = vector.shape_cast %3 : vector<8xf32> to vector<8x1xf32>
    %cst_3 = arith.constant dense<0.000000e+00> : vector<1xf32>
    %5 = vector.multi_reduction <add>, %4, %cst_3 [0] : vector<8x1xf32> to vector<1xf32>
    %6 = vector.shape_cast %5 : vector<1xf32> to vector<1x1xf32>
    %c0_4 = arith.constant 0 : index
    %c0_5 = arith.constant 0 : index
    %7 = vector.load %arg0[%c0_4, %c0_5] : memref<1x1xf32, #tpu.memory_space<vmem>>, vector<1x1xf32>
    %cst_6 = arith.constant 1.000000e+00 : f32
    %8 = vector.broadcast %cst_6 : f32 to vector<1x1xf32>
    %9 = arith.subf %8, %7 : vector<1x1xf32>
    %10 = arith.mulf %7, %7 : vector<1x1xf32>
    %11 = arith.mulf %9, %9 : vector<1x1xf32>
    %12 = arith.addf %10, %11 : vector<1x1xf32>
    %cst_7 = arith.constant 2.000000e+00 : f32
    %13 = vector.broadcast %cst_7 : f32 to vector<1x1xf32>
    %14 = arith.mulf %13, %7 : vector<1x1xf32>
    %15 = arith.mulf %14, %9 : vector<1x1xf32>
    %16 = arith.mulf %15, %6 : vector<1x1xf32>
    %17 = arith.addf %12, %16 : vector<1x1xf32>
    %18 = math.rsqrt %17 : vector<1x1xf32>
    %19 = arith.mulf %9, %18 : vector<1x1xf32>
    %20 = vector.broadcast %19 : vector<1x1xf32> to vector<8x125xf32>
    %21 = arith.mulf %0, %20 : vector<8x125xf32>
    %22 = arith.mulf %7, %18 : vector<1x1xf32>
    %23 = vector.broadcast %22 : vector<1x1xf32> to vector<8x125xf32>
    %24 = arith.mulf %1, %23 : vector<8x125xf32>
    %25 = arith.addf %21, %24 : vector<8x125xf32>
    %c0_8 = arith.constant 0 : index
    %c0_9 = arith.constant 0 : index
    %26 = vector.load %arg3[%c0_8, %c0_9] : memref<8x125xf32, #tpu.memory_space<vmem>>, vector<8x125xf32>
    tpu.vector_store %arg3[%c0_8, %c0_9], %25 {strides = array<i32>} : memref<8x125xf32, #tpu.memory_space<vmem>>, vector<8x125xf32>,
    return
  }
}

</mosaic_0001>

<bundles_post_ra>
// kernel: micro_forward.1
= control target key start
LH: loop header
LB: loop body
LE: loop exit
PB: predicated region body
PF: predicated region fallthrough
CT: control target
= control target key end

     0   :  { %vm19_vm0 = vcmask 1022976   ;;  %v72_v5 = vmov 0   ;;  %v41_v22 = vlaneseq  ;;  %s107_s1 = inlined_call_operand.vmem [shape: f32[8,125], index: 1, kind: input, shape index: {}]   ;;  %s108_s2 = inlined_call_operand.vmem [shape: f32[8,125], index: 2, kind: input, shape index: {}]   ;;  %s109_s0 = inlined_call_operand.<no memory space> [shape: f32[1,1], index: 0, kind: input, shape index: {}]   ;;  %s110_s3 = inlined_call_operand.vmem [shape: f32[8,125], index: 3, kind: output, shape index: {}]  }
   0x1   :  { %v16_v0 = vld [vmem:[%s107_s1] sm:$0xff]  ;;  %v8_v4 = vstv %s109_s0  ;;  %69 = vset.pattern.permute.xlu1 %v72_v5  ;;  %68 = vset.pattern.permute.xlu0 %v72_v5 }
   0x2   :  { %v17_v1 = vld [vmem:[%s108_s2] sm:$0xff]  ;;  %9 = vst [vmem:[#allocation2] sm:$0x1] %v8_v4  ;;  %v42_v23 = vshrl.u32 %v41_v22, 7 }
   0x3   :  { %v18_v2 = vmul.f32 %v17_v1, %v16_v0 }
   0x4   :  { %v43_v24 = vsub.s32 0, %v42_v23 }
   0x5   :  { %v20_v3 = vsel %vm19_vm0, %v18_v2, 0.0 }
   0x6   :  { %21 = vadd.xlane.f32.xlu0 %v20_v3 }
   0x9   :  { %v29_v7 = vld [vmem:[#allocation2] sm:$0x1] }
   0xa   :  { %v30_v10 = vsub.f32 1.0, %v29_v7  ;;  %v34_v12 = vmul.f32 2.0, %v29_v7  ;;  %v31_v14 = vmul.f32 %v29_v7, %v29_v7 }
   0xc   :  { %v32_v15 = vmul.f32 %v30_v10, %v30_v10  ;;  %v35_v17 = vmul.f32 %v34_v12, %v30_v10 }
   0xe   :  { %v33_v19 = vadd.f32 %v32_v15, %v31_v14 }
  0x93   :  { %v22_v6 = vpop.xlane.xlu0 %21 }
  0x94   :  { %v23_v8 = vrot.slane %v22_v6, 4 }
  0x96   :  { %v24_v9 = vadd.f32 %v23_v8, %v22_v6 }
  0x98   :  { %v25_v11 = vrot.slane %v24_v9, 2 }
  0x9a   :  { %v26_v13 = vadd.f32 %v25_v11, %v24_v9 }
  0x9c   :  { %v27_v16 = vrot.slane %v26_v13, 1 }
  0x9e   :  { %v28_v18 = vadd.f32 %v27_v16, %v26_v13 }
  0xa0   :  { %v36_v20 = vmul.f32 %v35_v17, %v28_v18 }
  0xa2   :  { %v37_v21 = vadd.f32 %v36_v20, %v33_v19 }
  0xa4   :  { %70 = vrsqrt.f32 %v37_v21 }
  0xae   :  { %v71_v25 = vpop.eup %70 }
  0xaf   :  { %v50_v26 = vmul.f32 %v71_v25, %v29_v7  ;;  %v39_v27 = vmul.f32 %v71_v25, %v30_v10 }
  0xb1   :  { %v55_v28 = vrot.slane %v50_v26, %v43_v24  ;;  %v44_v29 = vrot.slane %v39_v27, %v43_v24 }
  0xb3   :  { %57 = vperm.xlu1 %69, %v55_v28   ;;  %46 = vperm.xlu0 %68, %v44_v29  }
 0x132   :  { %v58_v30 = vpop.permute.xlu1 %57  ;;  %v47_v31 = vpop.permute.xlu0 %46 }
 0x133   :  { %v60_v32 = vmul.f32 %v58_v30, %v17_v1  ;;  %v49_v33 = vmul.f32 %v47_v31, %v16_v0 }
 0x135   :  { %v61_v34 = vadd.f32 %v60_v32, %v49_v33 }
 0x137   :  { %62 = vst.msk [vmem:[%s110_s3] sm:$0xff] %vm19_vm0, %v61_v34 }

</bundles_post_ra>
